<compile_context>
chip_gen: v7x
topology: tpu7x:2x2x1
jax: 0.10.0
libtpu: 0.0.40
codegen_flags: <defaults>
</compile_context>

<pallas_src>
import jax
import jax.numpy as jnp
from jax.experimental import pallas as pl
from jax.experimental.pallas import tpu as pltpu

HIDDEN = 256


def _uncertainty_kernel(state_ref, action_ref,
                        w1s_ref, w1a_ref, b1_ref,
                        w2_ref, b2_ref,
                        w3_ref, b3_ref,
                        u_ref):
    # Layer 1: split matmul replaces cat([state, action], 1) @ W1.
    # bf16 operands on the MXU, f32 accumulation; bias/ReLU in f32 on the VPU.
    h = (jnp.dot(state_ref[...].astype(jnp.bfloat16), w1s_ref[...],
                 preferred_element_type=jnp.float32)
         + jnp.dot(action_ref[...].astype(jnp.bfloat16), w1a_ref[...],
                   preferred_element_type=jnp.float32)
         + b1_ref[...])
    h = jnp.maximum(h, 0.0)

    # Layer 2
    h = jnp.dot(h.astype(jnp.bfloat16), w2_ref[...],
                preferred_element_type=jnp.float32) + b2_ref[...]
    h = jnp.maximum(h, 0.0)

    # Layer 3 (output); b3 is a scalar held in SMEM.
    u_ref[...] = jnp.dot(h.astype(jnp.bfloat16), w3_ref[...],
                         preferred_element_type=jnp.float32) + b3_ref[0, 0]


def uncertainty_forward(state, action, params, *, block_b=256):
    """Returns u of shape [batch, 1], matching UncertaintyNet.forward."""
    w1s, w1a, b1, w2, b2, w3, b3 = params

    state = state.astype(jnp.float32)
    action = action.astype(jnp.float32)
    B, state_dim = state.shape
    action_dim = action.shape[1]

    # Pad the batch to a multiple of the row tile (sliced off at the end).
    padded_b = pl.cdiv(B, block_b) * block_b
    if padded_b != B:
        pad = padded_b - B
        state = jnp.pad(state, ((0, pad), (0, 0)))
        action = jnp.pad(action, ((0, pad), (0, 0)))
    grid = (padded_b // block_b,)

    # bf16 MXU operands (params are kept in f32; biases stay f32).
    w1s_b = w1s.astype(jnp.bfloat16)
    w1a_b = w1a.astype(jnp.bfloat16)
    w2_b = w2.astype(jnp.bfloat16)
    w3_b = w3.astype(jnp.bfloat16)

    def resident(shape):
        # Constant block index => fetched once, VMEM-resident across the grid.
        return pl.BlockSpec(shape, lambda i: (0, 0))

    u = pl.pallas_call(
        _uncertainty_kernel,
        out_shape=jax.ShapeDtypeStruct((padded_b, 1), jnp.float32),
        grid=grid,
        in_specs=[
            pl.BlockSpec((block_b, state_dim), lambda i: (i, 0)),
            pl.BlockSpec((block_b, action_dim), lambda i: (i, 0)),
            resident(w1s_b.shape),
            resident(w1a_b.shape),
            resident(b1.shape),
            resident(w2_b.shape),
            resident(b2.shape),
            resident(w3_b.shape),
            pl.BlockSpec(memory_space=pltpu.MemorySpace.SMEM),   # b3 scalar
        ],
        out_specs=pl.BlockSpec((block_b, 1), lambda i: (i, 0)),
        compiler_params=pltpu.CompilerParams(
            dimension_semantics=("parallel",)),
    )(state, action, w1s_b, w1a_b, b1, w2_b, b2, w3_b, b3)

    return u[:B]


def init_params(key, state_dim, action_dim):
    """Deterministic synthetic init (PyTorch Linear-style uniform ±1/sqrt(fan_in)).

    Weights are stored pre-transposed as [in_features, out_features]; W1 is
    pre-split into state / action parts so the kernel needs no concatenation.
    """
    sa_dim = state_dim + action_dim
    k = jax.random.split(key, 6)

    def lin(kw, kb, fan_in, fan_out):
        bound = 1.0 / (float(fan_in) ** 0.5)
        w = jax.random.uniform(kw, (fan_in, fan_out),
                               minval=-bound, maxval=bound, dtype=jnp.float32)
        b = jax.random.uniform(kb, (1, fan_out),
                               minval=-bound, maxval=bound, dtype=jnp.float32)
        return w, b

    w1, b1 = lin(k[0], k[1], sa_dim, HIDDEN)
    w2, b2 = lin(k[2], k[3], HIDDEN, HIDDEN)
    w3, b3 = lin(k[4], k[5], HIDDEN, 1)
    w1s, w1a = w1[:state_dim], w1[state_dim:]
    return (w1s, w1a, b1, w2, b2, w3, b3)


def uncertainty_reference(state, action, params):
    """Pure-JAX reference mirroring the kernel numerics (bf16 operands, f32 acc)."""
    w1s, w1a, b1, w2, b2, w3, b3 = params
    sa = jnp.concatenate([state, action], axis=1).astype(jnp.float32)
    w1 = jnp.concatenate([w1s, w1a], axis=0)

    def mm(x, w):
        return jnp.dot(x.astype(jnp.bfloat16), w.astype(jnp.bfloat16),
                       preferred_element_type=jnp.float32)

    h = jnp.maximum(mm(sa, w1) + b1, 0.0)
    h = jnp.maximum(mm(h, w2) + b2, 0.0)
    return mm(h, w3) + b3


if __name__ == "__main__":
    key = jax.random.PRNGKey(0)
    k_state, k_action, k_params = jax.random.split(key, 3)

    # Small demo shapes; batch=300 exercises both the grid (3 tiles of 128)
    # and the non-multiple-of-tile padding path.
    batch, state_dim, action_dim = 300, 12, 4
    state = jax.random.normal(k_state, (batch, state_dim), dtype=jnp.float32)
    action = jax.random.normal(k_action, (batch, action_dim), dtype=jnp.float32)
    params = init_params(k_params, state_dim, action_dim)

    u = uncertainty_forward(state, action, params, block_b=128)
    u = jax.block_until_ready(u)

    u_ref = uncertainty_reference(state, action, params)
    assert u.shape == (batch, 1)
    err = float(jnp.max(jnp.abs(u - u_ref)))
    assert jnp.allclose(u, u_ref, atol=2e-3, rtol=2e-3), err

    print("KERNEL_OK")
</pallas_src>

<mosaic_0001>
module attributes {stable_mosaic.version = 11 : i64} {
  func.func @_uncertainty_kernel(%arg0: i32, %arg1: memref<128x12xf32, #tpu.memory_space<vmem>>, %arg2: memref<128x4xf32, #tpu.memory_space<vmem>>, %arg3: memref<12x256xbf16, #tpu.memory_space<vmem>>, %arg4: memref<4x256xbf16, #tpu.memory_space<vmem>>, %arg5: memref<1x256xf32, #tpu.memory_space<vmem>>, %arg6: memref<256x256xbf16, #tpu.memory_space<vmem>>, %arg7: memref<1x256xf32, #tpu.memory_space<vmem>>, %arg8: memref<256x1xbf16, #tpu.memory_space<vmem>>, %arg9: memref<1x1xf32, #tpu.memory_space<smem>>, %arg10: memref<128x1xf32, #tpu.memory_space<vmem>>) attributes {dimension_semantics = [#tpu.dimension_semantics<parallel>], iteration_bounds = array<i64: 3>, scalar_prefetch = 0 : i64, scratch_operands = 0 : i64, tpu.core_type = #tpu.core_type<tc>, window_params = [{transform_indices = @transform_0, window_bounds = array<i64: 128, 12>}, {transform_indices = @transform_1, window_bounds = array<i64: 128, 4>}, {pipeline_mode = #tpu.pipeline_mode<synchronous>, transform_indices = @transform_2, window_bounds = array<i64: 12, 256>}, {pipeline_mode = #tpu.pipeline_mode<synchronous>, transform_indices = @transform_3, window_bounds = array<i64: 4, 256>}, {pipeline_mode = #tpu.pipeline_mode<synchronous>, transform_indices = @transform_4, window_bounds = array<i64: 1, 256>}, {pipeline_mode = #tpu.pipeline_mode<synchronous>, transform_indices = @transform_5, window_bounds = array<i64: 256, 256>}, {pipeline_mode = #tpu.pipeline_mode<synchronous>, transform_indices = @transform_6, window_bounds = array<i64: 1, 256>}, {pipeline_mode = #tpu.pipeline_mode<synchronous>, transform_indices = @transform_7, window_bounds = array<i64: 256, 1>}, {transform_indices = @transform_8, window_bounds = array<i64: 1, 1>}, {transform_indices = @transform_9, window_bounds = array<i64: 128, 1>}]} {
    %c0 = arith.constant 0 : index
    %c0_0 = arith.constant 0 : index
    %0 = vector.load %arg1[%c0, %c0_0] : memref<128x12xf32, #tpu.memory_space<vmem>>, vector<128x12xf32>
    %1 = arith.truncf %0 : vector<128x12xf32> to vector<128x12xbf16>
    %c0_1 = arith.constant 0 : index
    %c0_2 = arith.constant 0 : index
    %2 = vector.load %arg3[%c0_1, %c0_2] : memref<12x256xbf16, #tpu.memory_space<vmem>>, vector<12x256xbf16>
    %cst = arith.constant dense<0.000000e+00> : vector<128x256xf32>
    %3 = tpu.matmul %1, %2, %cst {dimension_numbers = #tpu.dot_dimension_numbers<[1], [0], [0], [1], [0, 0, 1, 1], [], []>} : vector<128x12xbf16>, vector<12x256xbf16>, vector<128x256xf32> -> vector<128x256xf32>
    %c0_3 = arith.constant 0 : index
    %c0_4 = arith.constant 0 : index
    %4 = vector.load %arg2[%c0_3, %c0_4] : memref<128x4xf32, #tpu.memory_space<vmem>>, vector<128x4xf32>
    %5 = arith.truncf %4 : vector<128x4xf32> to vector<128x4xbf16>
    %c0_5 = arith.constant 0 : index
    %c0_6 = arith.constant 0 : index
    %6 = vector.load %arg4[%c0_5, %c0_6] : memref<4x256xbf16, #tpu.memory_space<vmem>>, vector<4x256xbf16>
    %cst_7 = arith.constant dense<0.000000e+00> : vector<128x256xf32>
    %7 = tpu.matmul %5, %6, %cst_7 {dimension_numbers = #tpu.dot_dimension_numbers<[1], [0], [0], [1], [0, 0, 1, 1], [], []>} : vector<128x4xbf16>, vector<4x256xbf16>, vector<128x256xf32> -> vector<128x256xf32>
    %8 = arith.addf %3, %7 : vector<128x256xf32>
    %c0_8 = arith.constant 0 : index
    %c0_9 = arith.constant 0 : index
    %9 = vector.load %arg5[%c0_8, %c0_9] : memref<1x256xf32, #tpu.memory_space<vmem>>, vector<1x256xf32>
    %10 = vector.broadcast %9 : vector<1x256xf32> to vector<128x256xf32>
    %11 = arith.addf %8, %10 : vector<128x256xf32>
    %cst_10 = arith.constant 0.000000e+00 : f32
    %12 = vector.broadcast %cst_10 : f32 to vector<128x256xf32>
    %13 = arith.maximumf %11, %12 : vector<128x256xf32>
    %14 = arith.truncf %13 : vector<128x256xf32> to vector<128x256xbf16>
    %c0_11 = arith.constant 0 : index
    %c0_12 = arith.constant 0 : index
    %15 = vector.load %arg6[%c0_11, %c0_12] : memref<256x256xbf16, #tpu.memory_space<vmem>>, vector<256x256xbf16>
    %cst_13 = arith.constant dense<0.000000e+00> : vector<128x256xf32>
    %16 = tpu.matmul %14, %15, %cst_13 {dimension_numbers = #tpu.dot_dimension_numbers<[1], [0], [0], [1], [0, 0, 1, 1], [], []>} : vector<128x256xbf16>, vector<256x256xbf16>, vector<128x256xf32> -> vector<128x256xf32>
    %c0_14 = arith.constant 0 : index
    %c0_15 = arith.constant 0 : index
    %17 = vector.load %arg7[%c0_14, %c0_15] : memref<1x256xf32, #tpu.memory_space<vmem>>, vector<1x256xf32>
    %18 = vector.broadcast %17 : vector<1x256xf32> to vector<128x256xf32>
    %19 = arith.addf %16, %18 : vector<128x256xf32>
    %cst_16 = arith.constant 0.000000e+00 : f32
    %20 = vector.broadcast %cst_16 : f32 to vector<128x256xf32>
    %21 = arith.maximumf %19, %20 : vector<128x256xf32>
    %22 = arith.truncf %21 : vector<128x256xf32> to vector<128x256xbf16>
    %c0_17 = arith.constant 0 : index
    %c0_18 = arith.constant 0 : index
    %23 = vector.load %arg8[%c0_17, %c0_18] : memref<256x1xbf16, #tpu.memory_space<vmem>>, vector<256x1xbf16>
    %cst_19 = arith.constant dense<0.000000e+00> : vector<128x1xf32>
    %24 = tpu.matmul %22, %23, %cst_19 {dimension_numbers = #tpu.dot_dimension_numbers<[1], [0], [0], [1], [0, 0, 1, 1], [], []>} : vector<128x256xbf16>, vector<256x1xbf16>, vector<128x1xf32> -> vector<128x1xf32>
    %c0_20 = arith.constant 0 : index
    %c0_21 = arith.constant 0 : index
    %25 = memref.load %arg9[%c0_20, %c0_21] : memref<1x1xf32, #tpu.memory_space<smem>>
    %26 = vector.broadcast %25 : f32 to vector<128x1xf32>
    %27 = arith.addf %24, %26 : vector<128x1xf32>
    %c0_22 = arith.constant 0 : index
    %c0_23 = arith.constant 0 : index
    %28 = vector.load %arg10[%c0_22, %c0_23] : memref<128x1xf32, #tpu.memory_space<vmem>>, vector<128x1xf32>
    tpu.vector_store %arg10[%c0_22, %c0_23], %27 {strides = array<i32>} : memref<128x1xf32, #tpu.memory_space<vmem>>, vector<128x1xf32>,
    return
  }
  func.func @transform_0(%arg0: i32) -> (i32, i32) {
    %c0_i32 = arith.constant 0 : i32
    %c0_i32_0 = arith.constant 0 : i32
    return %arg0, %c0_i32 : i32, i32
  }
  func.func @transform_1(%arg0: i32) -> (i32, i32) {
    %c0_i32 = arith.constant 0 : i32
    %c0_i32_0 = arith.constant 0 : i32
    return %arg0, %c0_i32 : i32, i32
  }
  func.func @transform_2(%arg0: i32) -> (i32, i32) {
    %c0_i32 = arith.constant 0 : i32
    %c0_i32_0 = arith.constant 0 : i32
    %c0_i32_1 = arith.constant 0 : i32
    return %c0_i32, %c0_i32_0 : i32, i32
  }
  func.func @transform_3(%arg0: i32) -> (i32, i32) {
    %c0_i32 = arith.constant 0 : i32
    %c0_i32_0 = arith.constant 0 : i32
    %c0_i32_1 = arith.constant 0 : i32
    return %c0_i32, %c0_i32_0 : i32, i32
  }
  func.func @transform_4(%arg0: i32) -> (i32, i32) {
    %c0_i32 = arith.constant 0 : i32
    %c0_i32_0 = arith.constant 0 : i32
    %c0_i32_1 = arith.constant 0 : i32
    return %c0_i32, %c0_i32_0 : i32, i32
  }
  func.func @transform_5(%arg0: i32) -> (i32, i32) {
    %c0_i32 = arith.constant 0 : i32
    %c0_i32_0 = arith.constant 0 : i32
    %c0_i32_1 = arith.constant 0 : i32
    return %c0_i32, %c0_i32_0 : i32, i32
  }
  func.func @transform_6(%arg0: i32) -> (i32, i32) {
    %c0_i32 = arith.constant 0 : i32
    %c0_i32_0 = arith.constant 0 : i32
    %c0_i32_1 = arith.constant 0 : i32
    return %c0_i32, %c0_i32_0 : i32, i32
  }
  func.func @transform_7(%arg0: i32) -> (i32, i32) {
    %c0_i32 = arith.constant 0 : i32
    %c0_i32_0 = arith.constant 0 : i32
    %c0_i32_1 = arith.constant 0 : i32
    return %c0_i32, %c0_i32_0 : i32, i32
  }
  func.func @transform_8(%arg0: i32) -> (i32, i32) {
    %c0_i32 = arith.constant 0 : i32
    %c0_i32_0 = arith.constant 0 : i32
    %c0_i32_1 = arith.constant 0 : i32
    return %c0_i32, %c0_i32_0 : i32, i32
  }
  func.func @transform_9(%arg0: i32) -> (i32, i32) {
    %c0_i32 = arith.constant 0 : i32
    %c0_i32_0 = arith.constant 0 : i32
    return %arg0, %c0_i32 : i32, i32
  }
}

</mosaic_0001>

<bundles_post_ra>
// kernel: tpu_custom_call.1
= control target key start
LH: loop header
LB: loop body
LE: loop exit
PB: predicated region body
PF: predicated region fallthrough
CT: control target
= control target key end

     0   :  { %s1835_s11 = smov 0   ;;  %s2333_s0 = inlined_call_operand.vmem [shape: f32[384,12], index: 0, kind: input, shape index: {}]   ;;  %s2334_s1 = inlined_call_operand.vmem [shape: f32[384,4], index: 1, kind: input, shape index: {}]   ;;  %s2335_s2 = inlined_call_operand.vmem [shape: bf16[12,256], index: 2, kind: input, shape index: {}]   ;;  %s2336_s3 = inlined_call_operand.vmem [shape: bf16[4,256], index: 3, kind: input, shape index: {}]   ;;  %s2337_s4 = inlined_call_operand.vmem [shape: f32[1,256], index: 4, kind: input, shape index: {}]   ;;  %s2338_s5 = inlined_call_operand.vmem [shape: bf16[256,256], index: 5, kind: input, shape index: {}]   ;;  %s2339_s6 = inlined_call_operand.vmem [shape: f32[1,256], index: 6, kind: input, shape index: {}]   ;;  %s2340_s7 = inlined_call_operand.vmem [shape: bf16[256,1], index: 7, kind: input, shape index: {}]   ;;  %s2341_s8 = inlined_call_operand.<no memory space> [shape: f32[1,1], index: 8, kind: input, shape index: {}]   ;;  %s2342_s9 = inlined_call_operand.vmem [shape: f32[384,1], index: 9, kind: output, shape index: {}]  }
   0x1   :  { %14 = sst [smem:[#allocation2]] %s2341_s8 }
   0x2 LB: > { %s1487_s12 = sadd.s32 4294967295, %s1779_s11   ;;  %p1491_p0 = scmp.ge.s32.totalorder %s1779_s11, 1  ;;  %s1779_s11 = sphi %s1835_s11, %s20_s11  }
   0x3   : > { %p300_p1 = scmp.lt.s32.totalorder %s1779_s11, 4 }
   0x5   : > { %p301_p2 = pnand %p1491_p0, %p300_p1 }
   0x6   : > { %v1498_v0 = vld.sshfl [vmem:[%s2336_s3] sm:$0x33 pattern:$0x76325410] (!%p301_p2)  ;;  %vm445_vm0 = vcmask (!%p301_p2), 1041408   ;;  %v1781_v3 = vmov (!%p301_p2), 0  }
   0x7   : > { %304 = sbr.rel (%p301_p2) target bundleno = 804 (0x324), region = 56  ;;  %v419_v1 = vcombine.high (!%p301_p2), %v1498_v0, %v1498_v0  ;;  %v447_v2 = vsel (!%p301_p2), %vm445_vm0, %v1498_v0, 0  ;;  %484 = vmatprep.mubr.bf16.mxu0 (!%p301_p2), %v1781_v3  ;;  %s1492_s8 = sshll.u32 (!%p301_p2), %s1487_s12, 4  ;;  %v1706_v4 = vld [vmem:[%s2335_s2 + $0x4] ss:$8 sps:$4 sm:$0x3f] (!%p301_p2)  }
   0x8   : > { %vm598_vm1 = vcmask (!%p301_p2), 1045504   ;;  %p342_p3 = scmp.lt.s32.totalorder (!%p301_p2), %s1492_s8, 47  ;;  %v1711_v5 = vld [vmem:[%s2338_s5 + $0x4] ss:$8 sps:$4 sm:$0xff] (!%p301_p2)   ;;  %v1860_v7 = vld [vmem:[%s2338_s5] ss:$8 sps:$4 sm:$0xff] (!%p301_p2)  }
   0x9   : > { %1499 = vmatprep.subr.msk.bf16.mxu0 (!%p301_p2), %vm445_vm0, %v419_v1  ;;  %v1708_v6 = vld [vmem:[%s2335_s2] ss:$8 sps:$4 sm:$0x3f] (!%p301_p2)   ;;  %v1867_v8 = vld [vmem:[%s2338_s5 + $0x14] ss:$8 sps:$4 sm:$0xff] (!%p301_p2)   ;;  %1633 = vmatprep.subr.bf16.mxu1 (!%p301_p2), %v1711_v5  ;;  %vm420_vm2 = vcmask (!%p301_p2), 31744  }
   0xa   : > { %453 = vmatpush1.bf16.msra.mxu0 (!%p301_p2), %v447_v2  ;;  %1649 = vmatpush1.bf16.msra.mxu1 (!%p301_p2), %v1860_v7  ;;  %v600_v12 = vsel (!%p301_p2), %vm598_vm1, %v1708_v6, 0  ;;  %v1883_v13 = vld [vmem:[%s2338_s5 + $0x10] ss:$8 sps:$4 sm:$0xff] (!%p301_p2)   ;;  %v1889_v14 = vld [vmem:[%s2338_s5 + $0x24] ss:$8 sps:$4 sm:$0xff] (!%p301_p2)   ;;  %vm573_vm3 = vcmask (!%p301_p2), 97280  }
   0xb   : > { %1510 = vmatprep.subr.msk.bf16.mxu0 (!%p301_p2), %vm598_vm1, %v1706_v4  ;;  %1634 = vmatprep.subr.bf16.mxu1 (!%p301_p2), %v1867_v8  ;;  %v1898_v17 = vld [vmem:[%s2338_s5 + $0x20] ss:$8 sps:$4 sm:$0xff] (!%p301_p2)   ;;  %v1907_v20 = vld [vmem:[%s2338_s5 + $0x34] ss:$8 sps:$4 sm:$0xff] (!%p301_p2)   ;;  %v1914_v22 = vld [vmem:[%s2338_s5 + $0x30] ss:$8 sps:$4 sm:$0xff] (!%p301_p2)  }
   0xc   : > { %v1919_v23 = vld [vmem:[%s2338_s5 + $0x44] ss:$8 sps:$4 sm:$0xff] (!%p301_p2)   ;;  %v1927_v25 = vld [vmem:[%s2338_s5 + $0x40] ss:$8 sps:$4 sm:$0xff] (!%p301_p2)   ;;  %v1932_v26 = vld [vmem:[%s2338_s5 + $0x54] ss:$8 sps:$4 sm:$0xff] (!%p301_p2)  }
   0xd   : > { %v1943_v29 = vld [vmem:[%s2338_s5 + $0x50] ss:$8 sps:$4 sm:$0xff] (!%p301_p2)   ;;  %v1948_v30 = vld [vmem:[%s2338_s5 + $0x64] ss:$8 sps:$4 sm:$0xff] (!%p301_p2)   ;;  %v1955_v32 = vld [vmem:[%s2338_s5 + $0x60] ss:$8 sps:$4 sm:$0xff] (!%p301_p2)  }
   0xe   : > { %s2344_s8 = smov (!%p342_p3, %s1492_s8), 47  ;;  %1650 = vmatpush1.bf16.msra.mxu1 %v1883_v13  ;;  %v1960_v33 = vld [vmem:[%s2338_s5 + $0x74] ss:$8 sps:$4 sm:$0xff]   ;;  %v1967_v36 = vld [vmem:[%s2338_s5 + $0x70] ss:$8 sps:$4 sm:$0xff]   ;;  %s1207_s27 = sld [smem:[#allocation2]] }
   0xf   : > { %s1862_s23 = sshll.u32 %s2344_s8, 3  ;;  %1635 = vmatprep.subr.bf16.mxu1 %v1889_v14  ;;  %v1974_v37 = vld [vmem:[%s2338_s5 + $0x84] ss:$8 sps:$4 sm:$0xff]   ;;  %v1981_v38 = vld [vmem:[%s2338_s5 + $0x80] ss:$8 sps:$4 sm:$0xff]   ;;  %vm1402_vm4 = vcmask 7168  }
  0x10   : > { %s1873_s28 = scalar_lea.vmem %s2334_s1, %s1862_s23  ;;  %v1987_v40 = vld [vmem:[%s2338_s5 + $0x94] ss:$8 sps:$4 sm:$0xff]   ;;  %v1999_v43 = vld [vmem:[%s2338_s5 + $0x90] ss:$8 sps:$4 sm:$0xff]   ;;  %v2004_v44 = vld [vmem:[%s2338_s5 + $0xa4] ss:$8 sps:$4 sm:$0xff]   ;;  %s2062_s22 = scalar_lea.vmem %s2333_s0, %s1862_s23 }
  0x11   : > { %v386_v9 = vld [vmem:[%s1873_s28] sm:$0xff]  ;;  %v387_v10 = vld [vmem:[%s1873_s28 + $0x8] sm:$0xff]  ;;  %v388_v15 = vld [vmem:[%s1873_s28 + $0x10] sm:$0xff]  ;;  %s2280_s10 = scalar_lea.vmem %s2342_s9, %s1862_s23 }
  0x12   : > { %v402_v11 = vpack.c.bf16 %v387_v10, %v386_v9  ;;  %v389_v16 = vld [vmem:[%s1873_s28 + $0x18] sm:$0xff]  ;;  %1651 = vmatpush1.bf16.msra.mxu1 %v1898_v17  ;;  %v390_v19 = vld [vmem:[%s1873_s28 + $0x20] sm:$0xff]  ;;  %v391_v21 = vld [vmem:[%s1873_s28 + $0x28] sm:$0xff] }
  0x13   : > { %v403_v18 = vpack.c.bf16 %v389_v16, %v388_v15  ;;  %1636 = vmatprep.subr.bf16.mxu1 %v1907_v20  ;;  %v404_v24 = vpack.c.bf16 %v391_v21, %v390_v19  ;;  %v392_v27 = vld [vmem:[%s1873_s28 + $0x30] sm:$0xff]  ;;  %v393_v28 = vld [vmem:[%s1873_s28 + $0x38] sm:$0xff]  ;;  %v394_v34 = vld [vmem:[%s1873_s28 + $0x40] sm:$0xff] }
  0x14   : > { %1500 = vmatmul.mubr.msk.bf16.vlgmr.msra.gmra.mrb[0].mxu0 %vm420_vm2, %v402_v11  ;;  %v405_v31 = vpack.c.bf16 %v393_v28, %v392_v27  ;;  %v395_v35 = vld [vmem:[%s1873_s28 + $0x48] sm:$0xff]  ;;  %v396_v41 = vld [vmem:[%s1873_s28 + $0x50] sm:$0xff]  ;;  %v397_v42 = vld [vmem:[%s1873_s28 + $0x58] sm:$0xff] }
  0x15   : > { %606 = vmatpush1.bf16.msra.mxu0 %v600_v12  ;;  %494 = vmatprep.mubr.bf16.mxu0 %v1781_v3  ;;  %v406_v39 = vpack.c.bf16 %v395_v35, %v394_v34  ;;  %v407_v45 = vpack.c.bf16 %v397_v42, %v396_v41  ;;  %v2011_v46 = vld [vmem:[%s2338_s5 + $0xa0] ss:$8 sps:$4 sm:$0xff]   ;;  %v2016_v47 = vld [vmem:[%s2338_s5 + $0xb4] ss:$8 sps:$4 sm:$0xff]   ;;  %v2027_v50 = vld [vmem:[%s2338_s5 + $0xb0] ss:$8 sps:$4 sm:$0xff]  }
  0x16   : > { %1014 = vmatprep.subr.bf16.mxu0 %v1711_v5  ;;  %1652 = vmatpush1.bf16.msra.mxu1 %v1914_v22  ;;  %v398_v48 = vld [vmem:[%s1873_s28 + $0x60] sm:$0xff]  ;;  %v399_v49 = vld [vmem:[%s1873_s28 + $0x68] sm:$0xff]  ;;  %v2044_v54 = vld [vmem:[%s2338_s5 + $0xd4] ss:$8 sps:$4 sm:$0xff]  }
  0x17   : > { %1637 = vmatprep.subr.bf16.mxu1 %v1919_v23  ;;  %v2032_v51 = vld [vmem:[%s2338_s5 + $0xc4] ss:$8 sps:$4 sm:$0xff]   ;;  %v408_v52 = vpack.c.bf16 %v399_v49, %v398_v48  ;;  %v2039_v53 = vld [vmem:[%s2338_s5 + $0xc0] ss:$8 sps:$4 sm:$0xff]   ;;  %v400_v55 = vld [vmem:[%s1873_s28 + $0x70] sm:$0xff] }
  0x18   : > { %v401_v56 = vld [vmem:[%s1873_s28 + $0x78] sm:$0xff]  ;;  %v360_v59 = vld [vmem:[%s2062_s22] sm:$0xff]  ;;  %v361_v60 = vld [vmem:[%s2062_s22 + $0x8] sm:$0xff] }
  0x19   : > { %v2055_v57 = vld [vmem:[%s2338_s5 + $0xd0] ss:$8 sps:$4 sm:$0xff]   ;;  %v409_v58 = vpack.c.bf16 %v401_v56, %v400_v55  ;;  %v376_v61 = vpack.c.bf16 %v361_v60, %v360_v59  ;;  %v364_v1 = vld [vmem:[%s2062_s22 + $0x20] sm:$0xff]  ;;  %v365_v2 = vld [vmem:[%s2062_s22 + $0x28] sm:$0xff] }
  0x1a   : > { %1653 = vmatpush1.bf16.msra.mxu1 %v1927_v25  ;;  %v362_v62 = vld [vmem:[%s2062_s22 + $0x10] sm:$0xff]  ;;  %v363_v63 = vld [vmem:[%s2062_s22 + $0x18] sm:$0xff]  ;;  %v378_v4 = vpack.c.bf16 %v365_v2, %v364_v1  ;;  %v369_v9 = vld [vmem:[%s2062_s22 + $0x48] sm:$0xff] }
  0x1b   : > { %1638 = vmatprep.subr.bf16.mxu1 %v1932_v26  ;;  %v377_v0 = vpack.c.bf16 %v363_v63, %v362_v62  ;;  %v366_v5 = vld [vmem:[%s2062_s22 + $0x30] sm:$0xff]  ;;  %v367_v6 = vld [vmem:[%s2062_s22 + $0x38] sm:$0xff]  ;;  %v373_v15 = vld [vmem:[%s2062_s22 + $0x68] sm:$0xff] }
  0x1c   : > { %1501 = vmatmul.mubr.msk.bf16.gmra.mrb[4].mxu0 %vm420_vm2, %v403_v18  ;;  %v370_v11 = vld [vmem:[%s2062_s22 + $0x50] sm:$0xff]  ;;  %v371_v12 = vld [vmem:[%s2062_s22 + $0x58] sm:$0xff]  ;;  %v1751_v21 = vld [vmem:[%s2338_s5 + $0xe0] ss:$8 sps:$4 sm:$0xff]  }
  0x1d   : > { %504 = vmatprep.mubr.bf16.mxu0 %v1781_v3  ;;  %v375_v18 = vld [vmem:[%s2062_s22 + $0x78] sm:$0xff]  ;;  %v718_v27 = vld [vmem:[%s2337_s4] sm:$0x3] }
  0x1e   : > { %1654 = vmatpush1.bf16.msra.mxu1 %v1943_v29 }
  0x1f   : > { %1639 = vmatprep.subr.bf16.mxu1 %v1948_v30 }
  0x22   : > { %1655 = vmatpush1.bf16.msra.mxu1 %v1955_v32 }
  0x23   : > { %1640 = vmatprep.subr.bf16.mxu1 %v1960_v33 }
  0x24   : > { %1502 = vmatmul.mubr.msk.bf16.gmra.mrb[8].mxu0 %vm420_vm2, %v404_v24  ;;  %v720_v24 = vlaneseq }
  0x25   : > { %514 = vmatprep.mubr.bf16.mxu0 %v1781_v3 }
  0x26   : > { %1656 = vmatpush1.bf16.msra.mxu1 %v1967_v36 }
  0x27   : > { %1641 = vmatprep.subr.bf16.mxu1 %v1974_v37 }
  0x2a   : > { %1657 = vmatpush1.bf16.msra.mxu1 %v1981_v38 }
  0x2b   : > { %1642 = vmatprep.subr.bf16.mxu1 %v1987_v40 }
  0x2c   : > { %1503 = vmatmul.mubr.msk.bf16.gmra.mrb[12].mxu0 %vm420_vm2, %v405_v31 }
  0x2d   : > { %524 = vmatprep.mubr.bf16.mxu0 %v1781_v3 }
  0x2e   : > { %1658 = vmatpush1.bf16.msra.mxu1 %v1999_v43 }
  0x2f   : > { %1643 = vmatprep.subr.bf16.mxu1 %v2004_v44 }
  0x32   : > { %1659 = vmatpush1.bf16.msra.mxu1 %v2011_v46 }
  0x33   : > { %1644 = vmatprep.subr.bf16.mxu1 %v2016_v47 }
  0x34   : > { %1504 = vmatmul.mubr.msk.bf16.gmra.mrb[16].mxu0 %vm420_vm2, %v406_v39 }
  0x35   : > { %534 = vmatprep.mubr.bf16.mxu0 %v1781_v3 }
  0x36   : > { %1660 = vmatpush1.bf16.msra.mxu1 %v2027_v50 }
  0x37   : > { %1645 = vmatprep.subr.bf16.mxu1 %v2032_v51 }
  0x3a   : > { %1661 = vmatpush1.bf16.msra.mxu1 %v2039_v53 }
  0x3b   : > { %1646 = vmatprep.subr.bf16.mxu1 %v2044_v54 }
  0x3c   : > { %1505 = vmatmul.mubr.msk.bf16.gmra.mrb[20].mxu0 %vm420_vm2, %v407_v45 }
  0x3d   : > { %544 = vmatprep.mubr.bf16.mxu0 %v1781_v3 }
  0x3e   : > { %1662 = vmatpush1.bf16.msra.mxu1 %v2055_v57 }
  0x44   : > { %1506 = vmatmul.mubr.msk.bf16.gmra.mrb[24].mxu0 %vm420_vm2, %v408_v52 }
  0x45   : > { %554 = vmatprep.mubr.bf16.mxu0 %v1781_v3 }
  0x4c   : > { %1507 = vmatmul.mubr.msk.bf16.gmra.mrb[28].mxu0 %vm420_vm2, %v409_v58 }
  0x4d   : > { %637 = vmatprep.mubr.bf16.mxu0 %v1781_v3 }
  0x54   : > { %1511 = vmatmul.mubr.msk.bf16.vlgmr.msra.gmra.mrb[0].mxu0 %vm573_vm3, %v376_v61 }
  0x55   : > { %647 = vmatprep.mubr.bf16.mxu0 %v1781_v3  ;;  %1015 = vmatpush1.bf16.msra.mxu0 %v1860_v7  ;;  %v379_v7 = vpack.c.bf16 %v367_v6, %v366_v5 }
  0x56   : > { %1016 = vmatprep.subr.bf16.mxu0 %v1867_v8  ;;  %v368_v8 = vld [vmem:[%s2062_s22 + $0x40] sm:$0xff] }
  0x57   : > { %v380_v10 = vpack.c.bf16 %v369_v9, %v368_v8 }
  0x59   : > { %1017 = vmatpush1.bf16.msra.mxu0 %v1883_v13  ;;  %v381_v13 = vpack.c.bf16 %v371_v12, %v370_v11 }
  0x5a   : > { %1018 = vmatprep.subr.bf16.mxu0 %v1889_v14  ;;  %v372_v14 = vld [vmem:[%s2062_s22 + $0x60] sm:$0xff] }
  0x5b   : > { %v382_v16 = vpack.c.bf16 %v373_v15, %v372_v14 }
  0x5c   : > { %1512 = vmatmul.mubr.msk.bf16.gmra.mrb[4].mxu0 %vm573_vm3, %v377_v0 }
  0x5d   : > { %657 = vmatprep.mubr.bf16.mxu0 %v1781_v3  ;;  %1019 = vmatpush1.bf16.msra.mxu0 %v1898_v17  ;;  %v374_v17 = vld [vmem:[%s2062_s22 + $0x70] sm:$0xff] }
  0x5e   : > { %1020 = vmatprep.subr.bf16.mxu0 %v1907_v20  ;;  %v383_v19 = vpack.c.bf16 %v375_v18, %v374_v17  ;;  %v1753_v20 = vld [vmem:[%s2338_s5 + $0xe4] ss:$8 sps:$4 sm:$0xff]  }
  0x5f   : > { %1647 = vmatprep.subr.bf16.mxu1 %v1753_v20 }
  0x60   : > { %1663 = vmatpush1.bf16.msra.mxu1 %v1751_v21 }
  0x61   : > { %1021 = vmatpush1.bf16.msra.mxu0 %v1914_v22  ;;  %v1754_v22 = vld [vmem:[%s2338_s5 + $0xf0] ss:$8 sps:$4 sm:$0xff]  }
  0x62   : > { %1022 = vmatprep.subr.bf16.mxu0 %v1919_v23  ;;  %v1757_v23 = vld [vmem:[%s2340_s7 + $0x40] sm:$0xff]  }
  0x64   : > { %1513 = vmatmul.mubr.msk.bf16.gmra.mrb[8].mxu0 %vm573_vm3, %v378_v4 }
  0x65   : > { %667 = vmatprep.mubr.bf16.mxu0 %v1781_v3  ;;  %1023 = vmatpush1.bf16.msra.mxu0 %v1927_v25  ;;  %v2139_v25 = vshrl.u32 %v720_v24, 7 }
  0x66   : > { %1024 = vmatprep.subr.bf16.mxu0 %v1932_v26 }
  0x67   : > { %v722_v26 = vsub.s32 0, %v2139_v25  ;;  %v726_v28 = vsub.s32 1, %v2139_v25 }
  0x69   : > { %1025 = vmatpush1.bf16.msra.mxu0 %v1943_v29  ;;  %v2148_v29 = vrot.slane %v718_v27, %v722_v26 }
  0x6a   : > { %1026 = vmatprep.subr.bf16.mxu0 %v1948_v30  ;;  %v2152_v30 = vrot.slane %v718_v27, %v726_v28 }
  0x6c   : > { %1514 = vmatmul.mubr.msk.bf16.gmra.mrb[12].mxu0 %vm573_vm3, %v379_v7 }
  0x6d   : > { %677 = vmatprep.mubr.bf16.mxu0 %v1781_v3  ;;  %1027 = vmatpush1.bf16.msra.mxu0 %v1955_v32 }
  0x6e   : > { %1028 = vmatprep.subr.bf16.mxu0 %v1960_v33 }
  0x71   : > { %1029 = vmatpush1.bf16.msra.mxu0 %v1967_v36 }
  0x72   : > { %1030 = vmatprep.subr.bf16.mxu0 %v1974_v37 }
  0x74   : > { %1515 = vmatmul.mubr.msk.bf16.gmra.mrb[16].mxu0 %vm573_vm3, %v380_v10 }
  0x75   : > { %687 = vmatprep.mubr.bf16.mxu0 %v1781_v3  ;;  %1031 = vmatpush1.bf16.msra.mxu0 %v1981_v38 }
  0x76   : > { %1032 = vmatprep.subr.bf16.mxu0 %v1987_v40 }
  0x79   : > { %1033 = vmatpush1.bf16.msra.mxu0 %v1999_v43 }
  0x7a   : > { %1034 = vmatprep.subr.bf16.mxu0 %v2004_v44 }
  0x7c   : > { %1516 = vmatmul.mubr.msk.bf16.gmra.mrb[20].mxu0 %vm573_vm3, %v381_v13 }
  0x7d   : > { %697 = vmatprep.mubr.bf16.mxu0 %v1781_v3  ;;  %1035 = vmatpush1.bf16.msra.mxu0 %v2011_v46 }
  0x7e   : > { %1036 = vmatprep.subr.bf16.mxu0 %v2016_v47 }
  0x81   : > { %1037 = vmatpush1.bf16.msra.mxu0 %v2027_v50 }
  0x82   : > { %1038 = vmatprep.subr.bf16.mxu0 %v2032_v51 }
  0x84   : > { %1517 = vmatmul.mubr.msk.bf16.gmra.mrb[24].mxu0 %vm573_vm3, %v382_v16 }
  0x85   : > { %707 = vmatprep.mubr.bf16.mxu0 %v1781_v3  ;;  %1039 = vmatpush1.bf16.msra.mxu0 %v2039_v53  ;;  %v1756_v3 = vld [vmem:[%s2338_s5 + $0xf4] ss:$8 sps:$4 sm:$0xff]  }
  0x86   : > { %1040 = vmatprep.subr.bf16.mxu0 %v2044_v54  ;;  %1648 = vmatprep.subr.bf16.mxu1 %v1756_v3 }
  0x87   : > { %1664 = vmatpush1.bf16.msra.mxu1 %v1754_v22 }
  0x88   : > { %1569 = vmatprep.subr.bf16.mxu1 %v1757_v23 }
  0x89   : > { %1041 = vmatpush1.bf16.msra.mxu0 %v2055_v57 }
  0x8a   : > { %1042 = vmatprep.subr.bf16.mxu0 %v1753_v20 }
  0x8c   : > { %1518 = vmatmul.mubr.msk.bf16.gmra.mrb[28].mxu0 %vm573_vm3, %v383_v19 }
  0x8d   : > { %1043 = vmatpush1.bf16.msra.mxu0 %v1751_v21 }
  0x8e   : > { %1044 = vmatprep.subr.bf16.mxu0 %v1756_v3 }
  0x91   : > { %1045 = vmatpush1.bf16.msra.mxu0 %v1754_v22 }
 0x127   : > { %v639_v31 = vpop.f32.mrb[0].mxu0 }
 0x128   : > { %v730_v32 = vadd.f32 %v2148_v29, %v639_v31  ;;  %v641_v33 = vpop.f32.mrb[1].mxu0 }
 0x129   : > { %v731_v34 = vadd.f32 %v2152_v30, %v641_v33  ;;  %v643_v35 = vpop.f32.mrb[2].mxu0 }
 0x12a   : > { %v732_v36 = vadd.f32 %v2148_v29, %v643_v35  ;;  %v645_v37 = vpop.f32.mrb[3].mxu0  ;;  %v762_v39 = vmax.f32 %v730_v32, 0.0 }
 0x12b   : > { %v733_v38 = vadd.f32 %v2152_v30, %v645_v37  ;;  %v763_v41 = vmax.f32 %v731_v34, 0.0 }
 0x12c   : > { %v764_v40 = vmax.f32 %v732_v36, 0.0 }
 0x12d   : > { %v765_v42 = vmax.f32 %v733_v38, 0.0 }
 0x12e   : > { %v794_v43 = vpack.c.bf16 %v764_v40, %v762_v39 }
 0x12f   : > { %v795_v44 = vpack.c.bf16 %v765_v42, %v763_v41  ;;  %v649_v45 = vpop.f32.mrb[4].mxu0 }
 0x130   : > { %v734_v46 = vadd.f32 %v2148_v29, %v649_v45  ;;  %v651_v47 = vpop.f32.mrb[5].mxu0 }
 0x131   : > { %v735_v48 = vadd.f32 %v2152_v30, %v651_v47  ;;  %v653_v49 = vpop.f32.mrb[6].mxu0  ;;  %1046 = vmatprep.mubr.bf16.mxu0 %v795_v44 }
 0x132   : > { %v736_v50 = vadd.f32 %v2148_v29, %v653_v49  ;;  %v655_v51 = vpop.f32.mrb[7].mxu0  ;;  %1047 = vmatmul.mubr.bf16.vlgmr.msra.gmra.mrb[32].mxu0 %v794_v43  ;;  %v766_v53 = vmax.f32 %v734_v46, 0.0  ;;  %v1758_v43 = vld [vmem:[%s2340_s7] sm:$0xff]   ;;  %v1759_v46 = vld [vmem:[%s2340_s7 + $0x48] sm:$0xff]  }
 0x133   : > { %v737_v52 = vadd.f32 %v2152_v30, %v655_v51  ;;  %v767_v55 = vmax.f32 %v735_v48, 0.0 }
 0x134   : > { %v768_v54 = vmax.f32 %v736_v50, 0.0 }
 0x135   : > { %v769_v56 = vmax.f32 %v737_v52, 0.0  ;;  %v1760_v52 = vld [vmem:[%s2340_s7 + $0x8] sm:$0xff]  }
 0x136   : > { %v796_v57 = vpack.c.bf16 %v768_v54, %v766_v53 }
 0x137   : > { %v797_v58 = vpack.c.bf16 %v769_v56, %v767_v55  ;;  %v659_v59 = vpop.f32.mrb[8].mxu0  ;;  %v1761_v55 = vld [vmem:[%s2340_s7 + $0x50] sm:$0xff]  }
 0x138   : > { %v738_v60 = vadd.f32 %v2148_v29, %v659_v59  ;;  %v661_v61 = vpop.f32.mrb[9].mxu0 }
 0x139   : > { %v739_v62 = vadd.f32 %v2152_v30, %v661_v61  ;;  %v663_v63 = vpop.f32.mrb[10].mxu0  ;;  %1056 = vmatprep.mubr.bf16.mxu0 %v797_v58  ;;  %v1762_v61 = vld [vmem:[%s2340_s7 + $0x10] sm:$0xff]  }
 0x13a   : > { %v740_v0 = vadd.f32 %v2148_v29, %v663_v63  ;;  %v665_v1 = vpop.f32.mrb[11].mxu0  ;;  %1057 = vmatmul.mubr.bf16.gmra.mrb[36].mxu0 %v796_v57  ;;  %v770_v4 = vmax.f32 %v738_v60, 0.0 }
 0x13b   : > { %v741_v2 = vadd.f32 %v2152_v30, %v665_v1  ;;  %v771_v6 = vmax.f32 %v739_v62, 0.0 }
 0x13c   : > { %v772_v5 = vmax.f32 %v740_v0, 0.0  ;;  %v1763_v0 = vld [vmem:[%s2340_s7 + $0x58] sm:$0xff]  }
 0x13d   : > { %v773_v7 = vmax.f32 %v741_v2, 0.0 }
 0x13e   : > { %v798_v8 = vpack.c.bf16 %v772_v5, %v770_v4 }
 0x13f   : > { %v799_v9 = vpack.c.bf16 %v773_v7, %v771_v6  ;;  %v669_v10 = vpop.f32.mrb[12].mxu0  ;;  %v1764_v7 = vld [vmem:[%s2340_s7 + $0x18] sm:$0xff]  }
 0x140   : > { %v742_v11 = vadd.f32 %v2148_v29, %v669_v10  ;;  %v671_v12 = vpop.f32.mrb[13].mxu0  ;;  %v1765_v10 = vld [vmem:[%s2340_s7 + $0x60] sm:$0xff]  }
 0x141   : > { %v743_v13 = vadd.f32 %v2152_v30, %v671_v12  ;;  %v673_v14 = vpop.f32.mrb[14].mxu0  ;;  %1066 = vmatprep.mubr.bf16.mxu0 %v799_v9 }
 0x142   : > { %v744_v15 = vadd.f32 %v2148_v29, %v673_v14  ;;  %v675_v16 = vpop.f32.mrb[15].mxu0  ;;  %1067 = vmatmul.mubr.bf16.gmra.mrb[40].mxu0 %v798_v8  ;;  %v774_v18 = vmax.f32 %v742_v11, 0.0 }
 0x143   : > { %v745_v17 = vadd.f32 %v2152_v30, %v675_v16  ;;  %v775_v20 = vmax.f32 %v743_v13, 0.0  ;;  %v1766_v16 = vld [vmem:[%s2340_s7 + $0x20] sm:$0xff]  }
 0x144   : > { %v776_v19 = vmax.f32 %v744_v15, 0.0 }
 0x145   : > { %v777_v21 = vmax.f32 %v745_v17, 0.0 }
 0x146   : > { %v800_v3 = vpack.c.bf16 %v776_v19, %v774_v18  ;;  %v1767_v19 = vld [vmem:[%s2340_s7 + $0x68] sm:$0xff]  }
 0x147   : > { %v801_v22 = vpack.c.bf16 %v777_v21, %v775_v20  ;;  %v679_v23 = vpop.f32.mrb[16].mxu0 }
 0x148   : > { %v746_v24 = vadd.f32 %v2148_v29, %v679_v23  ;;  %v681_v27 = vpop.f32.mrb[17].mxu0 }
 0x149   : > { %v747_v31 = vadd.f32 %v2152_v30, %v681_v27  ;;  %v683_v32 = vpop.f32.mrb[18].mxu0  ;;  %1076 = vmatprep.mubr.bf16.mxu0 %v801_v22 }
 0x14a   : > { %v748_v33 = vadd.f32 %v2148_v29, %v683_v32  ;;  %v685_v34 = vpop.f32.mrb[19].mxu0  ;;  %1077 = vmatmul.mubr.bf16.gmra.mrb[44].mxu0 %v800_v3  ;;  %v778_v36 = vmax.f32 %v746_v24, 0.0  ;;  %v1768_v24 = vld [vmem:[%s2340_s7 + $0x28] sm:$0xff]  }
 0x14b   : > { %v749_v35 = vadd.f32 %v2152_v30, %v685_v34  ;;  %v779_v38 = vmax.f32 %v747_v31, 0.0 }
 0x14c   : > { %v780_v37 = vmax.f32 %v748_v33, 0.0 }
 0x14d   : > { %v781_v39 = vmax.f32 %v749_v35, 0.0 }
 0x14e   : > { %v802_v40 = vpack.c.bf16 %v780_v37, %v778_v36  ;;  %v1771_v36 = vld [vmem:[%s2340_s7 + $0x78] sm:$0xff]  }
 0x14f   : > { %v689_v41 = vpop.f32.mrb[20].mxu0  ;;  %v803_v42 = vpack.c.bf16 %v781_v39, %v779_v38  ;;  %v1772_v37 = vld [vmem:[%s2340_s7 + $0x38] sm:$0xff]   ;;  %v842_v38 = vld [vmem:[%s2339_s6] sm:$0x3] }
 0x150   : > { %v750_v44 = vadd.f32 %v2148_v29, %v689_v41  ;;  %v691_v45 = vpop.f32.mrb[21].mxu0  ;;  %v2236_v39 = vrot.slane %v842_v38, %v722_v26 }
 0x151   : > { %v751_v47 = vadd.f32 %v2152_v30, %v691_v45  ;;  %v693_v48 = vpop.f32.mrb[22].mxu0  ;;  %1086 = vmatprep.mubr.bf16.mxu1 %v803_v42 }
 0x152   : > { %v752_v49 = vadd.f32 %v2148_v29, %v693_v48  ;;  %v695_v50 = vpop.f32.mrb[23].mxu0  ;;  %1087 = vmatmul.mubr.bf16.vlgmr.msra.gmra.mrb[0].mxu1 %v802_v40  ;;  %v782_v53 = vmax.f32 %v750_v44, 0.0  ;;  %v2240_v40 = vrot.slane %v842_v38, %v726_v28 }
 0x153   : > { %v753_v51 = vadd.f32 %v2152_v30, %v695_v50  ;;  %1570 = vmatpush3.bf16.msra.mxu1 %v1758_v43  ;;  %v783_v56 = vmax.f32 %v751_v47, 0.0 }
 0x154   : > { %v784_v54 = vmax.f32 %v752_v49, 0.0  ;;  %1571 = vmatprep.subr.bf16.mxu1 %v1759_v46 }
 0x155   : > { %v785_v57 = vmax.f32 %v753_v51, 0.0 }
 0x156   : > { %v804_v58 = vpack.c.bf16 %v784_v54, %v782_v53 }
 0x157   : > { %v805_v59 = vpack.c.bf16 %v785_v57, %v783_v56  ;;  %v699_v60 = vpop.f32.mrb[24].mxu0  ;;  %1572 = vmatpush3.bf16.msra.mxu1 %v1760_v52 }
 0x158   : > { %v754_v62 = vadd.f32 %v2148_v29, %v699_v60  ;;  %v701_v63 = vpop.f32.mrb[25].mxu0  ;;  %1573 = vmatprep.subr.bf16.mxu1 %v1761_v55 }
 0x159   : > { %v755_v1 = vadd.f32 %v2152_v30, %v701_v63  ;;  %v703_v2 = vpop.f32.mrb[26].mxu0  ;;  %1096 = vmatprep.mubr.bf16.mxu1 %v805_v59 }
 0x15a   : > { %v756_v4 = vadd.f32 %v2148_v29, %v703_v2  ;;  %v705_v5 = vpop.f32.mrb[27].mxu0  ;;  %1097 = vmatmul.mubr.bf16.gmra.mrb[4].mxu1 %v804_v58  ;;  %v786_v8 = vmax.f32 %v754_v62, 0.0 }
 0x15b   : > { %v757_v6 = vadd.f32 %v2152_v30, %v705_v5  ;;  %1574 = vmatpush3.bf16.msra.mxu1 %v1762_v61  ;;  %v787_v11 = vmax.f32 %v755_v1, 0.0 }
 0x15c   : > { %v788_v9 = vmax.f32 %v756_v4, 0.0  ;;  %1575 = vmatprep.subr.bf16.mxu1 %v1763_v0 }
 0x15d   : > { %v789_v12 = vmax.f32 %v757_v6, 0.0 }
 0x15e   : > { %v806_v13 = vpack.c.bf16 %v788_v9, %v786_v8 }
 0x15f   : > { %v807_v14 = vpack.c.bf16 %v789_v12, %v787_v11  ;;  %v709_v15 = vpop.f32.mrb[28].mxu0  ;;  %1576 = vmatpush3.bf16.msra.mxu1 %v1764_v7 }
 0x160   : > { %v758_v17 = vadd.f32 %v2148_v29, %v709_v15  ;;  %v711_v18 = vpop.f32.mrb[29].mxu0  ;;  %1577 = vmatprep.subr.bf16.mxu1 %v1765_v10 }
 0x161   : > { %v759_v20 = vadd.f32 %v2152_v30, %v711_v18  ;;  %v713_v21 = vpop.f32.mrb[30].mxu0  ;;  %1106 = vmatprep.mubr.bf16.mxu1 %v807_v14 }
 0x162   : > { %v760_v3 = vadd.f32 %v2148_v29, %v713_v21  ;;  %v715_v22 = vpop.f32.mrb[31].mxu0  ;;  %1107 = vmatmul.mubr.bf16.gmra.mrb[8].mxu1 %v806_v13  ;;  %v790_v27 = vmax.f32 %v758_v17, 0.0  ;;  %v1769_v29 = vld [vmem:[%s2340_s7 + $0x70] sm:$0xff]  }
 0x163   : > { %v761_v23 = vadd.f32 %v2152_v30, %v715_v22  ;;  %1578 = vmatpush3.bf16.msra.mxu1 %v1766_v16  ;;  %v791_v32 = vmax.f32 %v759_v20, 0.0  ;;  %v1770_v30 = vld [vmem:[%s2340_s7 + $0x30] sm:$0xff]  }
 0x164   : > { %v792_v31 = vmax.f32 %v760_v3, 0.0  ;;  %1579 = vmatprep.subr.bf16.mxu1 %v1767_v19 }
 0x165   : > { %v793_v33 = vmax.f32 %v761_v23, 0.0 }
 0x166   : > { %v808_v34 = vpack.c.bf16 %v792_v31, %v790_v27 }
 0x167   : > { %v809_v35 = vpack.c.bf16 %v793_v33, %v791_v32  ;;  %1580 = vmatpush3.bf16.msra.mxu1 %v1768_v24 }
 0x168   : > { %1581 = vmatprep.subr.bf16.mxu1 %v1769_v29 }
 0x169   : > { %1116 = vmatprep.mubr.bf16.mxu1 %v809_v35 }
 0x16a   : > { %1117 = vmatmul.mubr.bf16.gmra.mrb[12].mxu1 %v808_v34 }
 0x16b   : > { %1582 = vmatpush3.bf16.msra.mxu1 %v1770_v30 }
 0x16c   : > { %1583 = vmatprep.subr.bf16.mxu1 %v1771_v36 }
 0x16f   : > { %1584 = vmatpush3.bf16.msra.mxu1 %v1772_v37 }
 0x205   : > { %v1048_v41 = vpop.f32.mrb[32].mxu0 }
 0x206   : > { %v1049_v42 = vadd.f32 %v1048_v41, %v2236_v39  ;;  %v1050_v43 = vpop.f32.mrb[33].mxu0 }
 0x207   : > { %v1051_v44 = vadd.f32 %v1050_v43, %v2240_v40  ;;  %v1052_v45 = vpop.f32.mrb[34].mxu0 }
 0x208   : > { %v1053_v46 = vadd.f32 %v1052_v45, %v2236_v39  ;;  %v1054_v47 = vpop.f32.mrb[35].mxu0  ;;  %v1127_v49 = vmax.f32 %v1049_v42, 0.0 }
 0x209   : > { %v1055_v48 = vadd.f32 %v1054_v47, %v2240_v40  ;;  %v1128_v26 = vmax.f32 %v1051_v44, 0.0 }
 0x20a   : > { %v1129_v50 = vmax.f32 %v1053_v46, 0.0 }
 0x20b   : > { %v1130_v51 = vmax.f32 %v1055_v48, 0.0 }
 0x20c   : > { %v1159_v52 = vpack.c.bf16 %v1129_v50, %v1127_v49 }
 0x20d   : > { %v1160_v25 = vpack.c.bf16 %v1130_v51, %v1128_v26  ;;  %v1058_v28 = vpop.f32.mrb[36].mxu0 }
 0x20e   : > { %v1059_v53 = vadd.f32 %v1058_v28, %v2236_v39  ;;  %v1060_v54 = vpop.f32.mrb[37].mxu0 }
 0x20f   : > { %v1061_v55 = vadd.f32 %v1060_v54, %v2240_v40  ;;  %v1062_v56 = vpop.f32.mrb[38].mxu0  ;;  %1337 = vmatprep.mubr.bf16.mxu1 %v1160_v25 }
 0x210   : > { %v1063_v57 = vadd.f32 %v1062_v56, %v2236_v39  ;;  %v1064_v58 = vpop.f32.mrb[39].mxu0  ;;  %1338 = vmatmul.mubr.bf16.vlgmr.msra.gmra.mrb[16].mxu1 %v1159_v52  ;;  %v1131_v60 = vmax.f32 %v1059_v53, 0.0 }
 0x211   : > { %v1065_v59 = vadd.f32 %v1064_v58, %v2240_v40  ;;  %v1132_v62 = vmax.f32 %v1061_v55, 0.0 }
 0x212   : > { %v1133_v61 = vmax.f32 %v1063_v57, 0.0 }
 0x213   : > { %v1134_v63 = vmax.f32 %v1065_v59, 0.0 }
 0x214   : > { %v1161_v0 = vpack.c.bf16 %v1133_v61, %v1131_v60 }
 0x215   : > { %v1162_v1 = vpack.c.bf16 %v1134_v63, %v1132_v62  ;;  %v1068_v2 = vpop.f32.mrb[40].mxu0 }
 0x216   : > { %v1069_v4 = vadd.f32 %v1068_v2, %v2236_v39  ;;  %v1070_v5 = vpop.f32.mrb[41].mxu0 }
 0x217   : > { %v1071_v6 = vadd.f32 %v1070_v5, %v2240_v40  ;;  %v1072_v7 = vpop.f32.mrb[42].mxu0  ;;  %1345 = vmatprep.mubr.bf16.mxu1 %v1162_v1 }
 0x218   : > { %v1073_v8 = vadd.f32 %v1072_v7, %v2236_v39  ;;  %v1074_v9 = vpop.f32.mrb[43].mxu0  ;;  %1346 = vmatmul.mubr.bf16.gmra.mrb[20].mxu1 %v1161_v0  ;;  %v1135_v11 = vmax.f32 %v1069_v4, 0.0 }
 0x219   : > { %v1075_v10 = vadd.f32 %v1074_v9, %v2240_v40  ;;  %v1136_v13 = vmax.f32 %v1071_v6, 0.0 }
 0x21a   : > { %v1137_v12 = vmax.f32 %v1073_v8, 0.0 }
 0x21b   : > { %v1138_v14 = vmax.f32 %v1075_v10, 0.0 }
 0x21c   : > { %v1163_v15 = vpack.c.bf16 %v1137_v12, %v1135_v11 }
 0x21d   : > { %v1164_v16 = vpack.c.bf16 %v1138_v14, %v1136_v13  ;;  %v1078_v17 = vpop.f32.mrb[44].mxu0 }
 0x21e   : > { %v1079_v18 = vadd.f32 %v1078_v17, %v2236_v39  ;;  %v1080_v19 = vpop.f32.mrb[45].mxu0 }
 0x21f   : > { %v1081_v20 = vadd.f32 %v1080_v19, %v2240_v40  ;;  %v1082_v21 = vpop.f32.mrb[46].mxu0  ;;  %1353 = vmatprep.mubr.bf16.mxu1 %v1164_v16 }
 0x220   : > { %v1083_v3 = vadd.f32 %v1082_v21, %v2236_v39  ;;  %v1084_v22 = vpop.f32.mrb[47].mxu0  ;;  %1354 = vmatmul.mubr.bf16.gmra.mrb[24].mxu1 %v1163_v15  ;;  %v1139_v24 = vmax.f32 %v1079_v18, 0.0 }
 0x221   : > { %v1085_v23 = vadd.f32 %v1084_v22, %v2240_v40  ;;  %v1140_v31 = vmax.f32 %v1081_v20, 0.0 }
 0x222   : > { %v1141_v27 = vmax.f32 %v1083_v3, 0.0 }
 0x223   : > { %v1142_v32 = vmax.f32 %v1085_v23, 0.0 }
 0x224   : > { %v1165_v33 = vpack.c.bf16 %v1141_v27, %v1139_v24  ;;  %v2274_v27 = vstv %s1207_s27 }
 0x225   : > { %v1166_v34 = vpack.c.bf16 %v1142_v32, %v1140_v31  ;;  %v1088_v35 = vpop.f32.mrb[0].mxu1 }
 0x226   : > { %v1089_v29 = vadd.f32 %v1088_v35, %v2236_v39  ;;  %v1090_v30 = vpop.f32.mrb[1].mxu1 }
 0x227   : > { %v1091_v36 = vadd.f32 %v1090_v30, %v2240_v40  ;;  %v1092_v37 = vpop.f32.mrb[2].mxu1  ;;  %1361 = vmatprep.mubr.bf16.mxu1 %v1166_v34 }
 0x228   : > { %v1093_v38 = vadd.f32 %v1092_v37, %v2236_v39  ;;  %v1094_v41 = vpop.f32.mrb[3].mxu1  ;;  %1362 = vmatmul.mubr.bf16.gmra.mrb[28].mxu1 %v1165_v33  ;;  %v1143_v43 = vmax.f32 %v1089_v29, 0.0 }
 0x229   : > { %v1095_v42 = vadd.f32 %v1094_v41, %v2240_v40  ;;  %v1144_v45 = vmax.f32 %v1091_v36, 0.0 }
 0x22a   : > { %v1145_v44 = vmax.f32 %v1093_v38, 0.0 }
 0x22b   : > { %v1146_v46 = vmax.f32 %v1095_v42, 0.0 }
 0x22c   : > { %v1167_v47 = vpack.c.bf16 %v1145_v44, %v1143_v43 }
 0x22d   : > { %v1168_v48 = vpack.c.bf16 %v1146_v46, %v1144_v45  ;;  %v1098_v49 = vpop.f32.mrb[4].mxu1 }
 0x22e   : > { %v1099_v50 = vadd.f32 %v1098_v49, %v2236_v39  ;;  %v1100_v26 = vpop.f32.mrb[5].mxu1 }
 0x22f   : > { %v1101_v51 = vadd.f32 %v1100_v26, %v2240_v40  ;;  %v1102_v52 = vpop.f32.mrb[6].mxu1  ;;  %1369 = vmatprep.mubr.bf16.mxu1 %v1168_v48 }
 0x230   : > { %v1103_v25 = vadd.f32 %v1102_v52, %v2236_v39  ;;  %v1104_v28 = vpop.f32.mrb[7].mxu1  ;;  %1370 = vmatmul.mubr.bf16.gmra.mrb[32].mxu1 %v1167_v47  ;;  %v1147_v54 = vmax.f32 %v1099_v50, 0.0 }
 0x231   : > { %v1105_v53 = vadd.f32 %v1104_v28, %v2240_v40  ;;  %v1148_v56 = vmax.f32 %v1101_v51, 0.0 }
 0x232   : > { %v1149_v55 = vmax.f32 %v1103_v25, 0.0 }
 0x233   : > { %v1150_v57 = vmax.f32 %v1105_v53, 0.0 }
 0x234   : > { %v1169_v58 = vpack.c.bf16 %v1149_v55, %v1147_v54 }
 0x235   : > { %v1170_v59 = vpack.c.bf16 %v1150_v57, %v1148_v56  ;;  %v1108_v60 = vpop.f32.mrb[8].mxu1 }
 0x236   : > { %v1109_v61 = vadd.f32 %v1108_v60, %v2236_v39  ;;  %v1110_v62 = vpop.f32.mrb[9].mxu1 }
 0x237   : > { %v1111_v63 = vadd.f32 %v1110_v62, %v2240_v40  ;;  %v1112_v0 = vpop.f32.mrb[10].mxu1  ;;  %1377 = vmatprep.mubr.bf16.mxu1 %v1170_v59 }
 0x238   : > { %v1113_v1 = vadd.f32 %v1112_v0, %v2236_v39  ;;  %v1114_v2 = vpop.f32.mrb[11].mxu1  ;;  %1378 = vmatmul.mubr.bf16.gmra.mrb[36].mxu1 %v1169_v58  ;;  %v1151_v5 = vmax.f32 %v1109_v61, 0.0 }
 0x239   : > { %v1115_v4 = vadd.f32 %v1114_v2, %v2240_v40  ;;  %v1152_v7 = vmax.f32 %v1111_v63, 0.0 }
 0x23a   : > { %v1153_v6 = vmax.f32 %v1113_v1, 0.0 }
 0x23b   : > { %v1154_v8 = vmax.f32 %v1115_v4, 0.0 }
 0x23c   : > { %v1171_v9 = vpack.c.bf16 %v1153_v6, %v1151_v5 }
 0x23d   : > { %v1172_v10 = vpack.c.bf16 %v1154_v8, %v1152_v7  ;;  %v1118_v11 = vpop.f32.mrb[12].mxu1 }
 0x23e   : > { %v1119_v12 = vadd.f32 %v1118_v11, %v2236_v39  ;;  %v1120_v13 = vpop.f32.mrb[13].mxu1 }
 0x23f   : > { %v1121_v14 = vadd.f32 %v1120_v13, %v2240_v40  ;;  %v1122_v15 = vpop.f32.mrb[14].mxu1  ;;  %1385 = vmatprep.mubr.bf16.mxu1 %v1172_v10 }
 0x240   : > { %v1123_v16 = vadd.f32 %v1122_v15, %v2236_v39  ;;  %v1124_v17 = vpop.f32.mrb[15].mxu1  ;;  %1386 = vmatmul.mubr.bf16.gmra.mrb[40].mxu1 %v1171_v9  ;;  %v1155_v19 = vmax.f32 %v1119_v12, 0.0 }
 0x241   : > { %v1125_v18 = vadd.f32 %v1124_v17, %v2240_v40  ;;  %v1156_v21 = vmax.f32 %v1121_v14, 0.0 }
 0x242   : > { %v1157_v20 = vmax.f32 %v1123_v16, 0.0 }
 0x243   : > { %v1158_v3 = vmax.f32 %v1125_v18, 0.0 }
 0x244   : > { %v1173_v22 = vpack.c.bf16 %v1157_v20, %v1155_v19 }
 0x245   : > { %v1174_v23 = vpack.c.bf16 %v1158_v3, %v1156_v21 }
 0x247   : > { %1393 = vmatprep.mubr.bf16.mxu1 %v1174_v23 }
 0x248   : > { %1394 = vmatmul.mubr.bf16.gmra.mrb[44].mxu1 %v1173_v22 }
 0x2e3   : > { %v1585_v24 = vpop.f32.mrb[16].mxu1 }
 0x2e4   : > { %v1586_v31 = vpop.f32.mrb[17].mxu1 }
 0x2e5   : > { %v1587_v32 = vadd.f32 %v1586_v31, %v1585_v24  ;;  %v1588_v39 = vpop.f32.mrb[18].mxu1 }
 0x2e6   : > { %v1589_v40 = vpop.f32.mrb[19].mxu1 }
 0x2e7   : > { %v1340_v33 = vadd.f32 %v1587_v32, %v2274_v27  ;;  %v1590_v34 = vadd.f32 %v1589_v40, %v1588_v39 }
 0x2e9   : > { %1403 = vst.msk [vmem:[%s2280_s10] sm:$0xff] %vm1402_vm4, %v1340_v33  ;;  %v1343_v35 = vadd.f32 %v1590_v34, %v2274_v27 }
 0x2eb   : > { %1404 = vst.msk [vmem:[%s2280_s10 + $0x8] sm:$0xff] %vm1402_vm4, %v1343_v35  ;;  %v1591_v29 = vpop.f32.mrb[20].mxu1 }
 0x2ec   : > { %v1592_v30 = vpop.f32.mrb[21].mxu1 }
 0x2ed   : > { %v1593_v36 = vadd.f32 %v1592_v30, %v1591_v29  ;;  %v1594_v37 = vpop.f32.mrb[22].mxu1 }
 0x2ee   : > { %v1595_v38 = vpop.f32.mrb[23].mxu1 }
 0x2ef   : > { %v1348_v41 = vadd.f32 %v1593_v36, %v2274_v27  ;;  %v1596_v42 = vadd.f32 %v1595_v38, %v1594_v37 }
 0x2f1   : > { %1405 = vst.msk [vmem:[%s2280_s10 + $0x10] sm:$0xff] %vm1402_vm4, %v1348_v41  ;;  %v1351_v43 = vadd.f32 %v1596_v42, %v2274_v27 }
 0x2f3   : > { %1406 = vst.msk [vmem:[%s2280_s10 + $0x18] sm:$0xff] %vm1402_vm4, %v1351_v43  ;;  %v1597_v44 = vpop.f32.mrb[24].mxu1 }
 0x2f4   : > { %v1598_v45 = vpop.f32.mrb[25].mxu1 }
 0x2f5   : > { %v1599_v46 = vadd.f32 %v1598_v45, %v1597_v44  ;;  %v1600_v47 = vpop.f32.mrb[26].mxu1 }
 0x2f6   : > { %v1601_v48 = vpop.f32.mrb[27].mxu1 }
 0x2f7   : > { %v1356_v49 = vadd.f32 %v1599_v46, %v2274_v27  ;;  %v1602_v50 = vadd.f32 %v1601_v48, %v1600_v47 }
 0x2f9   : > { %1407 = vst.msk [vmem:[%s2280_s10 + $0x20] sm:$0xff] %vm1402_vm4, %v1356_v49  ;;  %v1359_v26 = vadd.f32 %v1602_v50, %v2274_v27 }
 0x2fb   : > { %1408 = vst.msk [vmem:[%s2280_s10 + $0x28] sm:$0xff] %vm1402_vm4, %v1359_v26  ;;  %v1603_v51 = vpop.f32.mrb[28].mxu1 }
 0x2fc   : > { %v1604_v52 = vpop.f32.mrb[29].mxu1 }
 0x2fd   : > { %v1605_v25 = vadd.f32 %v1604_v52, %v1603_v51  ;;  %v1606_v28 = vpop.f32.mrb[30].mxu1 }
 0x2fe   : > { %v1607_v53 = vpop.f32.mrb[31].mxu1 }
 0x2ff   : > { %v1364_v54 = vadd.f32 %v1605_v25, %v2274_v27  ;;  %v1608_v55 = vadd.f32 %v1607_v53, %v1606_v28 }
 0x301   : > { %1409 = vst.msk [vmem:[%s2280_s10 + $0x30] sm:$0xff] %vm1402_vm4, %v1364_v54  ;;  %v1367_v56 = vadd.f32 %v1608_v55, %v2274_v27 }
 0x303   : > { %1410 = vst.msk [vmem:[%s2280_s10 + $0x38] sm:$0xff] %vm1402_vm4, %v1367_v56  ;;  %v1609_v57 = vpop.f32.mrb[32].mxu1 }
 0x304   : > { %v1610_v58 = vpop.f32.mrb[33].mxu1 }
 0x305   : > { %v1611_v59 = vadd.f32 %v1610_v58, %v1609_v57  ;;  %v1612_v60 = vpop.f32.mrb[34].mxu1 }
 0x306   : > { %v1613_v61 = vpop.f32.mrb[35].mxu1 }
 0x307   : > { %v1372_v62 = vadd.f32 %v1611_v59, %v2274_v27  ;;  %v1614_v63 = vadd.f32 %v1613_v61, %v1612_v60 }
 0x309   : > { %1411 = vst.msk [vmem:[%s2280_s10 + $0x40] sm:$0xff] %vm1402_vm4, %v1372_v62  ;;  %v1375_v0 = vadd.f32 %v1614_v63, %v2274_v27 }
 0x30b   : > { %1412 = vst.msk [vmem:[%s2280_s10 + $0x48] sm:$0xff] %vm1402_vm4, %v1375_v0  ;;  %v1615_v1 = vpop.f32.mrb[36].mxu1 }
 0x30c   : > { %v1616_v2 = vpop.f32.mrb[37].mxu1 }
 0x30d   : > { %v1617_v4 = vadd.f32 %v1616_v2, %v1615_v1  ;;  %v1618_v5 = vpop.f32.mrb[38].mxu1 }
 0x30e   : > { %v1619_v6 = vpop.f32.mrb[39].mxu1 }
 0x30f   : > { %v1380_v7 = vadd.f32 %v1617_v4, %v2274_v27  ;;  %v1620_v8 = vadd.f32 %v1619_v6, %v1618_v5 }
 0x311   : > { %1413 = vst.msk [vmem:[%s2280_s10 + $0x50] sm:$0xff] %vm1402_vm4, %v1380_v7  ;;  %v1383_v9 = vadd.f32 %v1620_v8, %v2274_v27 }
 0x313   : > { %1414 = vst.msk [vmem:[%s2280_s10 + $0x58] sm:$0xff] %vm1402_vm4, %v1383_v9  ;;  %v1621_v10 = vpop.f32.mrb[40].mxu1 }
 0x314   : > { %v1622_v11 = vpop.f32.mrb[41].mxu1 }
 0x315   : > { %v1623_v12 = vadd.f32 %v1622_v11, %v1621_v10  ;;  %v1624_v13 = vpop.f32.mrb[42].mxu1 }
 0x316   : > { %v1625_v14 = vpop.f32.mrb[43].mxu1 }
 0x317   : > { %v1388_v15 = vadd.f32 %v1623_v12, %v2274_v27  ;;  %v1626_v16 = vadd.f32 %v1625_v14, %v1624_v13 }
 0x319   : > { %1415 = vst.msk [vmem:[%s2280_s10 + $0x60] sm:$0xff] %vm1402_vm4, %v1388_v15  ;;  %v1391_v17 = vadd.f32 %v1626_v16, %v2274_v27 }
 0x31b   : > { %1416 = vst.msk [vmem:[%s2280_s10 + $0x68] sm:$0xff] %vm1402_vm4, %v1391_v17  ;;  %v1627_v18 = vpop.f32.mrb[44].mxu1 }
 0x31c   : > { %v1628_v19 = vpop.f32.mrb[45].mxu1 }
 0x31d   : > { %v1629_v20 = vadd.f32 %v1628_v19, %v1627_v18  ;;  %v1630_v21 = vpop.f32.mrb[46].mxu1 }
 0x31e   : > { %v1631_v3 = vpop.f32.mrb[47].mxu1 }
 0x31f   : > { %v1396_v22 = vadd.f32 %v1629_v20, %v2274_v27  ;;  %v1632_v23 = vadd.f32 %v1631_v3, %v1630_v21 }
 0x321   : > { %1417 = vst.msk [vmem:[%s2280_s10 + $0x70] sm:$0xff] %vm1402_vm4, %v1396_v22  ;;  %v1399_v24 = vadd.f32 %v1632_v23, %v2274_v27 }
 0x323   : > { %1418 = vst.msk [vmem:[%s2280_s10 + $0x78] sm:$0xff] %vm1402_vm4, %v1399_v24 }
 0x324 PF: > { %s20_s11 = sadd.s32 1, %s1779_s11  }
 0x325   : > { %p17_p4 = scmp.ge.s32.totalorder %s20_s11, 5  }
 0x327   :  { %19 = sbr.rel (!%p17_p4) target bundleno = 2 (0x2), region = 89 }

</bundles_post_ra>
